<compile_context>
chip_gen: v6e
topology: v6e:2x2x1
jax: 0.10.0
libtpu: 0.0.40
codegen_flags: <defaults>
</compile_context>

<pallas_src>
import numpy as np
import jax
import jax.numpy as jnp
from jax.experimental import pallas as pl
from jax.experimental.pallas import tpu as pltpu

D_IN, D_H1, D_H2, D_OUT = 20, 40, 50, 10
LANE = 128    # padded feature dim for the resident weight slab
SUB = 8       # sublane multiple
MAX_TM = 512  # max batch-rows per grid step


def _round_up(n, m):
    return ((n + m - 1) // m) * m


def _mlp_kernel(x_ref, w_ref, b_ref, o_ref):
    # x_ref: (tm, 20)  w_ref: (3, 128, 128)  b_ref: (8, 128)  o_ref: (tm, 10)
    x = x_ref[...]
    # Layer 1: only the first D_IN rows of the padded W1 carry data.
    h = jnp.dot(x, w_ref[0, :D_IN, :], preferred_element_type=jnp.float32)
    h = jnp.maximum(h + b_ref[0:1, :], 0.0)                       # relu(linear1)
    # Padded lanes of h are exactly 0 (zero weight cols / zero bias), so the
    # full 128-wide matmuls below are numerically exact.
    h = jnp.dot(h, w_ref[1], preferred_element_type=jnp.float32)
    h = jnp.maximum(h + b_ref[1:2, :], 0.0)                       # relu(linear2)
    y = jnp.dot(h, w_ref[2], preferred_element_type=jnp.float32) + b_ref[2:3, :]
    o_ref[...] = y[:, :D_OUT].astype(o_ref.dtype)                 # linear3, narrow store


def pack_params(w1, b1, w2, b2, w3, b3):
    """Zero-pad weights to (128,128) / biases to (128,), pack into 2 slabs."""
    def pad_w(w):
        return jnp.pad(w, ((0, LANE - w.shape[0]), (0, LANE - w.shape[1])))

    def pad_b(b):
        b = b.reshape(-1)
        return jnp.pad(b, (0, LANE - b.shape[0]))

    w_slab = jnp.stack([pad_w(w1), pad_w(w2), pad_w(w3)])                   # (3,128,128)
    b_slab = jnp.pad(jnp.stack([pad_b(b1), pad_b(b2), pad_b(b3)]),
                     ((0, SUB - 3), (0, 0)))                                # (8,128)
    return w_slab, b_slab


def _tiling(batch):
    """Return (tm, b_pad) with b_pad an exact multiple of tm."""
    if batch <= 256:
        # Single tile spanning the whole batch: block dims equal the full array
        # dims, so the (8,128) constraint is satisfied with no row padding.
        return batch, batch
    # >= 2 grid steps so the parallel axis can use both v7x TensorCores;
    # tm is a multiple of 8, capped at MAX_TM.
    tm = min(MAX_TM, _round_up(pl.cdiv(batch, 2), SUB))
    return tm, _round_up(batch, tm)


@jax.jit
def mlp_forward(x, w_slab, b_slab):
    batch = x.shape[0]
    tm, b_pad = _tiling(batch)
    x_in = x if b_pad == batch else jnp.pad(x, ((0, b_pad - batch), (0, 0)))

    flops = 2 * batch * (D_IN * D_H1 + D_H1 * D_H2 + D_H2 * D_OUT)
    bytes_accessed = 4 * (x_in.size + w_slab.size + b_slab.size + b_pad * D_OUT)

    out = pl.pallas_call(
        _mlp_kernel,
        out_shape=jax.ShapeDtypeStruct((b_pad, D_OUT), jnp.float32),
        grid=(pl.cdiv(b_pad, tm),),
        in_specs=[
            pl.BlockSpec((tm, D_IN), lambda i: (i, 0)),           # x tile (unpadded lanes)
            pl.BlockSpec((3, LANE, LANE), lambda i: (0, 0, 0)),   # weight slab (VMEM-resident)
            pl.BlockSpec((SUB, LANE), lambda i: (0, 0)),          # bias slab (VMEM-resident)
        ],
        out_specs=pl.BlockSpec((tm, D_OUT), lambda i: (i, 0)),    # narrow (10-lane) store
        compiler_params=pltpu.CompilerParams(
            dimension_semantics=("parallel",)),
        cost_estimate=pl.CostEstimate(
            flops=flops, transcendentals=0, bytes_accessed=bytes_accessed),
    )(x_in, w_slab, b_slab)

    return out if b_pad == batch else out[:batch]


def init_linear(key, in_f, out_f):
    # Mimic torch.nn.Linear default init: U(-1/sqrt(in_f), 1/sqrt(in_f)).
    kw, kb = jax.random.split(key)
    bound = 1.0 / float(np.sqrt(in_f))
    # stored as (in_f, out_f) == torch weight (out_f, in_f) transposed
    w = jax.random.uniform(kw, (in_f, out_f), jnp.float32, -bound, bound)
    b = jax.random.uniform(kb, (out_f,), jnp.float32, -bound, bound)
    return w, b


def _ref_forward_np(x, w1, b1, w2, b2, w3, b3):
    x = np.asarray(x, np.float32)
    h = np.maximum(x @ np.asarray(w1) + np.asarray(b1), 0.0)
    h = np.maximum(h @ np.asarray(w2) + np.asarray(b2), 0.0)
    return h @ np.asarray(w3) + np.asarray(b3)


if __name__ == "__main__":
    key = jax.random.PRNGKey(0)
    k_x, k1, k2, k3, k_big = jax.random.split(key, 5)

    # Input matching the reference: x1 = torch.randn(2, 20)
    x1 = jax.random.normal(k_x, (2, D_IN), jnp.float32)

    w1, b1 = init_linear(k1, D_IN, D_H1)
    w2, b2 = init_linear(k2, D_H1, D_H2)
    w3, b3 = init_linear(k3, D_H2, D_OUT)
    w_slab, b_slab = pack_params(w1, b1, w2, b2, w3, b3)

    # Primary check: reference batch size 2 (single-tile, no pad/slice path).
    out = mlp_forward(x1, w_slab, b_slab)
    jax.block_until_ready(out)
    ref = _ref_forward_np(x1, w1, b1, w2, b2, w3, b3)
    assert out.shape == (2, D_OUT)
    np.testing.assert_allclose(np.asarray(out), ref, atol=1e-5, rtol=1e-5)

    # Secondary check: batch > 256 exercises the tiled (multi grid step) path
    # and validates the grid/padding fix for non-multiple-of-tile batches.
    xb = jax.random.normal(k_big, (260, D_IN), jnp.float32)
    out_b = mlp_forward(xb, w_slab, b_slab)
    jax.block_until_ready(out_b)
    ref_b = _ref_forward_np(xb, w1, b1, w2, b2, w3, b3)
    assert out_b.shape == (260, D_OUT)
    np.testing.assert_allclose(np.asarray(out_b), ref_b, atol=1e-5, rtol=1e-5)

    print("KERNEL_OK")
</pallas_src>

<mosaic_0001>
module attributes {stable_mosaic.version = 11 : i64} {
  func.func @_mlp_kernel(%arg0: i32, %arg1: memref<2x20xf32, #tpu.memory_space<vmem>>, %arg2: memref<3x128x128xf32, #tpu.memory_space<vmem>>, %arg3: memref<8x128xf32, #tpu.memory_space<vmem>>, %arg4: memref<2x10xf32, #tpu.memory_space<vmem>>) attributes {dimension_semantics = [#tpu.dimension_semantics<parallel>], iteration_bounds = array<i64: 1>, scalar_prefetch = 0 : i64, scratch_operands = 0 : i64, tpu.core_type = #tpu.core_type<tc>, window_params = [{transform_indices = @transform_0, window_bounds = array<i64: 2, 20>}, {pipeline_mode = #tpu.pipeline_mode<synchronous>, transform_indices = @transform_1, window_bounds = array<i64: 3, 128, 128>}, {pipeline_mode = #tpu.pipeline_mode<synchronous>, transform_indices = @transform_2, window_bounds = array<i64: 8, 128>}, {transform_indices = @transform_3, window_bounds = array<i64: 2, 10>}]} {
    %c0 = arith.constant 0 : index
    %c0_0 = arith.constant 0 : index
    %0 = vector.load %arg1[%c0, %c0_0] : memref<2x20xf32, #tpu.memory_space<vmem>>, vector<2x20xf32>
    %c0_1 = arith.constant 0 : index
    %c0_2 = arith.constant 0 : index
    %c0_3 = arith.constant 0 : index
    %1 = vector.load %arg2[%c0_1, %c0_2, %c0_3] : memref<3x128x128xf32, #tpu.memory_space<vmem>>, vector<1x20x128xf32>
    %2 = vector.shape_cast %1 : vector<1x20x128xf32> to vector<20x128xf32>
    %cst = arith.constant dense<0.000000e+00> : vector<2x128xf32>
    %3 = tpu.matmul %0, %2, %cst {dimension_numbers = #tpu.dot_dimension_numbers<[1], [0], [0], [1], [0, 0, 1, 1], [], []>} : vector<2x20xf32>, vector<20x128xf32>, vector<2x128xf32> -> vector<2x128xf32>
    %c0_4 = arith.constant 0 : index
    %c0_5 = arith.constant 0 : index
    %4 = vector.load %arg3[%c0_4, %c0_5] : memref<8x128xf32, #tpu.memory_space<vmem>>, vector<1x128xf32>
    %5 = vector.broadcast %4 : vector<1x128xf32> to vector<2x128xf32>
    %6 = arith.addf %3, %5 : vector<2x128xf32>
    %cst_6 = arith.constant 0.000000e+00 : f32
    %7 = vector.broadcast %cst_6 : f32 to vector<2x128xf32>
    %8 = arith.maximumf %6, %7 : vector<2x128xf32>
    %c1 = arith.constant 1 : index
    %c0_7 = arith.constant 0 : index
    %c0_8 = arith.constant 0 : index
    %9 = vector.load %arg2[%c1, %c0_7, %c0_8] : memref<3x128x128xf32, #tpu.memory_space<vmem>>, vector<1x128x128xf32>
    %10 = vector.shape_cast %9 : vector<1x128x128xf32> to vector<128x128xf32>
    %cst_9 = arith.constant dense<0.000000e+00> : vector<2x128xf32>
    %11 = tpu.matmul %8, %10, %cst_9 {dimension_numbers = #tpu.dot_dimension_numbers<[1], [0], [0], [1], [0, 0, 1, 1], [], []>} : vector<2x128xf32>, vector<128x128xf32>, vector<2x128xf32> -> vector<2x128xf32>
    %c1_10 = arith.constant 1 : index
    %c0_11 = arith.constant 0 : index
    %12 = vector.load %arg3[%c1_10, %c0_11] : memref<8x128xf32, #tpu.memory_space<vmem>>, vector<1x128xf32>
    %13 = vector.broadcast %12 : vector<1x128xf32> to vector<2x128xf32>
    %14 = arith.addf %11, %13 : vector<2x128xf32>
    %cst_12 = arith.constant 0.000000e+00 : f32
    %15 = vector.broadcast %cst_12 : f32 to vector<2x128xf32>
    %16 = arith.maximumf %14, %15 : vector<2x128xf32>
    %c2 = arith.constant 2 : index
    %c0_13 = arith.constant 0 : index
    %c0_14 = arith.constant 0 : index
    %17 = vector.load %arg2[%c2, %c0_13, %c0_14] : memref<3x128x128xf32, #tpu.memory_space<vmem>>, vector<1x128x128xf32>
    %18 = vector.shape_cast %17 : vector<1x128x128xf32> to vector<128x128xf32>
    %cst_15 = arith.constant dense<0.000000e+00> : vector<2x128xf32>
    %19 = tpu.matmul %16, %18, %cst_15 {dimension_numbers = #tpu.dot_dimension_numbers<[1], [0], [0], [1], [0, 0, 1, 1], [], []>} : vector<2x128xf32>, vector<128x128xf32>, vector<2x128xf32> -> vector<2x128xf32>
    %c2_16 = arith.constant 2 : index
    %c0_17 = arith.constant 0 : index
    %20 = vector.load %arg3[%c2_16, %c0_17] : memref<8x128xf32, #tpu.memory_space<vmem>>, vector<1x128xf32>
    %21 = vector.broadcast %20 : vector<1x128xf32> to vector<2x128xf32>
    %22 = arith.addf %19, %21 : vector<2x128xf32>
    %23 = vector.extract_strided_slice %22 {offsets = [0, 0], sizes = [2, 10], strides = [1, 1]} : vector<2x128xf32> to vector<2x10xf32>
    %c0_18 = arith.constant 0 : index
    %c0_19 = arith.constant 0 : index
    %24 = vector.load %arg4[%c0_18, %c0_19] : memref<2x10xf32, #tpu.memory_space<vmem>>, vector<2x10xf32>
    tpu.vector_store %arg4[%c0_18, %c0_19], %23 {strides = array<i32>} : memref<2x10xf32, #tpu.memory_space<vmem>>, vector<2x10xf32>,
    return
  }
  func.func @transform_0(%arg0: i32) -> (i32, i32) {
    %c0_i32 = arith.constant 0 : i32
    %c0_i32_0 = arith.constant 0 : i32
    return %arg0, %c0_i32 : i32, i32
  }
  func.func @transform_1(%arg0: i32) -> (i32, i32, i32) {
    %c0_i32 = arith.constant 0 : i32
    %c0_i32_0 = arith.constant 0 : i32
    %c0_i32_1 = arith.constant 0 : i32
    %c0_i32_2 = arith.constant 0 : i32
    return %c0_i32, %c0_i32_0, %c0_i32_1 : i32, i32, i32
  }
  func.func @transform_2(%arg0: i32) -> (i32, i32) {
    %c0_i32 = arith.constant 0 : i32
    %c0_i32_0 = arith.constant 0 : i32
    %c0_i32_1 = arith.constant 0 : i32
    return %c0_i32, %c0_i32_0 : i32, i32
  }
  func.func @transform_3(%arg0: i32) -> (i32, i32) {
    %c0_i32 = arith.constant 0 : i32
    %c0_i32_0 = arith.constant 0 : i32
    return %arg0, %c0_i32 : i32, i32
  }
}

</mosaic_0001>

<bundles_post_ra>
// kernel: mlp_forward.1
= control target key start
LH: loop header
LB: loop body
LE: loop exit
PB: predicated region body
PF: predicated region fallthrough
CT: control target
= control target key end

     0   :  { %8 = vsyncpa [#allocation3], 0  ;;  %s640_s0 = inlined_call_operand.hbm [shape: f32[2,20], index: 0, kind: input, shape index: {}]   ;;  %s641_s1 = inlined_call_operand.hbm [shape: f32[3,128,128], index: 1, kind: input, shape index: {}]   ;;  %s642_s2 = inlined_call_operand.hbm [shape: f32[8,128], index: 2, kind: input, shape index: {}]   ;;  %s643_s3 = inlined_call_operand.hbm [shape: f32[2,10], index: 3, kind: output, shape index: {}]  }
   0x1   :  { %9 = vsyncpa [#allocation6], 0 }
   0x2   :  { %10 = vsyncpa [#allocation4], 0  ;;  %s559_s12 = smov [#allocation5]  }
   0x3   :  { %s26_s13 = sshll.u32 %s559_s12, 4  ;;  %s27_s13 = int_to_ptr.vmem [resolvable:$true] %s26_s13 }
   0x4   :  { %s481_s14 = scalar_lea.vmem %s27_s13, 6144  ;;  %p486_p1 = scmp.lt.s32.totalorder %s27_s13, %s27_s13 }
   0x5   :  { %p482_p0 = scmp.ne.s32.totalorder %s27_s13, %s481_s14  ;;  %p487_p2 = scmp.lt.s32.totalorder %s481_s14, %s481_s14 }
   0x7   :  { %p488_p3 = por %p487_p2, %p486_p1 }
   0x9   :  { %p489_p4 = pnand %p488_p3, %p482_p0 }
   0xb   :  { %492 = shalt.err (!%p489_p4)
}
   0xc   :  { %s560_s15 = smov 128   ;;  %s561_s16 = smov 8  }
   0xd   :  { %32 = dma.hbm_to_vmem [thread:$0]  %s641_s1, 6144, %s27_s13, [#allocation6], %s560_s15, %s560_s15, %s561_s16  }
   0xe   :  { %s562_s19 = smov [#allocation2]   ;;  %s563_s21 = smov [#allocation7]  }
   0xf   :  { %s17_s20 = sshll.u32 %s562_s19, 4  ;;  %s39_s22 = sshll.u32 %s563_s21, 4  ;;  %s18_s20 = int_to_ptr.vmem [resolvable:$true] %s17_s20  ;;  %s40_s22 = int_to_ptr.vmem [resolvable:$true] %s39_s22 }
  0x10   :  { %s501_s23 = scalar_lea.vmem %s18_s20, 32  ;;  %p506_p6 = scmp.lt.s32.totalorder %s18_s20, %s18_s20 }
  0x11   :  { %p502_p5 = scmp.ne.s32.totalorder %s18_s20, %s501_s23  ;;  %p507_p7 = scmp.lt.s32.totalorder %s501_s23, %s501_s23 }
  0x13   :  { %p508_p8 = por %p507_p7, %p506_p6 }
  0x15   :  { %p509_p9 = pnand %p508_p8, %p502_p5 }
  0x17   :  { %512 = shalt.err (!%p509_p9)
}
  0x18   :  { %20 = dma.hbm_to_vmem [thread:$0]  %s640_s0, 32, %s18_s20, [#allocation3]  }
  0x19   :  { %s521_s26 = scalar_lea.vmem %s40_s22, 128  ;;  %p526_p11 = scmp.lt.s32.totalorder %s40_s22, %s40_s22 }
  0x1a   :  { %p522_p10 = scmp.ne.s32.totalorder %s40_s22, %s521_s26  ;;  %p527_p12 = scmp.lt.s32.totalorder %s521_s26, %s521_s26 }
  0x1c   :  { %p528_p13 = por %p527_p12, %p526_p11 }
  0x1e   :  { %p529_p0 = pnand %p528_p13, %p522_p10 }
  0x20   :  { %532 = shalt.err (!%p529_p0)
}
  0x21   :  { %42 = dma.hbm_to_vmem [thread:$0]  %s642_s2, 128, %s40_s22, [#allocation6]  }
  0x22   :  { %553 = dma.done.wait [#allocation3], 32  }
  0x23   :  { %554 = vsyncadd [#allocation3], 4294967264 }
  0x24   :  { %555 = dma.done.wait [#allocation6], 6272  }
  0x25   :  { %556 = vsyncadd [#allocation6], 4294961024  ;;  %v564_v0 = vmov 0.0   ;;  %vm565_vm0 = vmmov 0   ;;  %vm65_vm1 = vcmask 1043456   ;;  %v54_v2 = vld [vmem:[#allocation5 + $0x8] sm:$0xff] }
  0x26   :  { %386 = vmatprep.subr.mxu0 %v564_v0  ;;  %392 = vmatprep.mubr.msk.f32.mxu0 %vm565_vm0, %v564_v0  ;;  %v55_v1 = vld [vmem:[#allocation5 + $0x10] sm:$0xf]  ;;  %v156_v3 = vld [vmem:[#allocation5 + $0xf8] sm:$0xff]  ;;  %v53_v5 = vld [vmem:[#allocation5] sm:$0xff]  ;;  %vm61_vm2 = vcmask 162816   ;;  %s566_s0 = smov [#allocation8]  }
  0x27   :  { %395 = vmatprep.subr.mxu1 %v564_v0  ;;  %427 = vmatprep.mubr.msk.f32.mxu1 %vm565_vm0, %v564_v0  ;;  %v155_v4 = vld [vmem:[#allocation5 + $0xf0] sm:$0xff]  ;;  %v52_v6 = vld [vmem:[#allocation2] sm:$0x3]  ;;  %v154_v7 = vld [vmem:[#allocation5 + $0xe8] sm:$0xff]  ;;  %s333_s2 = sshll.u32 %s566_s0, 4  ;;  %vm325_vm3 = vcmask 74752   ;;  %s334_s2 = int_to_ptr.vmem [resolvable:$true] %s333_s2 }
  0x28   :  { %387 = vmatpush3.msk.msra.mxu0 %vm65_vm1, %v55_v1  ;;  %396 = vmatpush3.msra.mxu1 %v156_v3  ;;  %v153_v8 = vld [vmem:[#allocation5 + $0xe0] sm:$0xff]  ;;  %v152_v9 = vld [vmem:[#allocation5 + $0xd8] sm:$0xff]  ;;  %v151_v10 = vld [vmem:[#allocation5 + $0xd0] sm:$0xff]  ;;  %s533_s28 = scalar_lea.vmem %s334_s2, 32  ;;  %p538_p2 = scmp.lt.s32.totalorder %s334_s2, %s334_s2 }
  0x29   :  { %388 = vmatprep.subr.mxu0 %v564_v0  ;;  %397 = vmatprep.subr.mxu1 %v564_v0  ;;  %v150_v11 = vld [vmem:[#allocation5 + $0xc8] sm:$0xff]  ;;  %v149_v12 = vld [vmem:[#allocation5 + $0xc0] sm:$0xff]  ;;  %v148_v13 = vld [vmem:[#allocation5 + $0xb8] sm:$0xff]  ;;  %p534_p1 = scmp.ne.s32.totalorder %s334_s2, %s533_s28  ;;  %p539_p3 = scmp.lt.s32.totalorder %s533_s28, %s533_s28 }
  0x2a   :  { %389 = vmatpush3.msra.mxu0 %v54_v2  ;;  %398 = vmatpush3.msra.mxu1 %v155_v4  ;;  %v147_v14 = vld [vmem:[#allocation5 + $0xb0] sm:$0xff]  ;;  %v146_v15 = vld [vmem:[#allocation5 + $0xa8] sm:$0xff]  ;;  %v145_v16 = vld [vmem:[#allocation5 + $0xa0] sm:$0xff] }
  0x2b   :  { %390 = vmatprep.subr.mxu0 %v564_v0  ;;  %399 = vmatprep.subr.mxu1 %v564_v0  ;;  %v144_v17 = vld [vmem:[#allocation5 + $0x98] sm:$0xff]  ;;  %v143_v18 = vld [vmem:[#allocation5 + $0x90] sm:$0xff]  ;;  %v142_v19 = vld [vmem:[#allocation5 + $0x88] sm:$0xff]  ;;  %p540_p4 = por %p539_p3, %p538_p2 }
  0x2c   :  { %391 = vmatpush3.msra.mxu0 %v53_v5  ;;  %400 = vmatpush3.msra.mxu1 %v154_v7  ;;  %v141_v20 = vld [vmem:[#allocation5 + $0x80] sm:$0xff]  ;;  %v249_v21 = vld [vmem:[#allocation5 + $0x178] sm:$0xff]  ;;  %v248_v22 = vld [vmem:[#allocation5 + $0x170] sm:$0xff] }
  0x2d   :  { %393 = vmatmul.mubr.msk.f32.vlgmr.msra.gmra.mxu0 %vm61_vm2, %v52_v6  ;;  %401 = vmatprep.subr.mxu1 %v564_v0  ;;  %v247_v23 = vld [vmem:[#allocation5 + $0x168] sm:$0xff]  ;;  %v246_v24 = vld [vmem:[#allocation5 + $0x160] sm:$0xff]  ;;  %v245_v25 = vld [vmem:[#allocation5 + $0x158] sm:$0xff]  ;;  %p541_p5 = pnand %p540_p4, %p534_p1 }
  0x2e   :  { %430 = vmatprep.subr.mxu0 %v564_v0  ;;  %402 = vmatpush3.msra.mxu1 %v153_v8  ;;  %v244_v26 = vld [vmem:[#allocation5 + $0x150] sm:$0xff]  ;;  %v243_v27 = vld [vmem:[#allocation5 + $0x148] sm:$0xff]  ;;  %v242_v28 = vld [vmem:[#allocation5 + $0x140] sm:$0xff] }
  0x2f   :  { %462 = vmatprep.mubr.msk.f32.mxu0 %vm565_vm0, %v564_v0  ;;  %403 = vmatprep.subr.mxu1 %v564_v0  ;;  %v241_v29 = vld [vmem:[#allocation5 + $0x138] sm:$0xff]  ;;  %v240_v30 = vld [vmem:[#allocation5 + $0x130] sm:$0xff]  ;;  %v239_v31 = vld [vmem:[#allocation5 + $0x128] sm:$0xff] }
  0x30   :  { %404 = vmatpush3.msra.mxu1 %v152_v9  ;;  %431 = vmatpush3.msra.mxu0 %v249_v21  ;;  %v238_v32 = vld [vmem:[#allocation5 + $0x120] sm:$0xff]  ;;  %v237_v33 = vld [vmem:[#allocation5 + $0x118] sm:$0xff]  ;;  %v236_v39 = vld [vmem:[#allocation5 + $0x110] sm:$0xff] }
  0x31   :  { %405 = vmatprep.subr.mxu1 %v564_v0  ;;  %432 = vmatprep.subr.mxu0 %v564_v0  ;;  %v343_v34 = vld [vmem:[#allocation7] ss:$0 sm:$0xff]  ;;  %v235_v40 = vld [vmem:[#allocation5 + $0x108] sm:$0xff]  ;;  %v346_v42 = vld [vmem:[#allocation7 + $0x1] ss:$0 sm:$0xff] }
  0x32   :  { %406 = vmatpush3.msra.mxu1 %v151_v10  ;;  %433 = vmatpush3.msra.mxu0 %v248_v22  ;;  %v234_v41 = vld [vmem:[#allocation5 + $0x100] sm:$0xff] }
  0x33   :  { %407 = vmatprep.subr.mxu1 %v564_v0  ;;  %434 = vmatprep.subr.mxu0 %v564_v0  ;;  %v347_v47 = vld [vmem:[#allocation7 + $0x2] ss:$0 sm:$0xff] }
  0x34   :  { %408 = vmatpush3.msra.mxu1 %v150_v11  ;;  %435 = vmatpush3.msra.mxu0 %v247_v23 }
  0x35   :  { %409 = vmatprep.subr.mxu1 %v564_v0  ;;  %436 = vmatprep.subr.mxu0 %v564_v0 }
  0x36   :  { %410 = vmatpush3.msra.mxu1 %v149_v12  ;;  %437 = vmatpush3.msra.mxu0 %v246_v24 }
  0x37   :  { %411 = vmatprep.subr.mxu1 %v564_v0  ;;  %438 = vmatprep.subr.mxu0 %v564_v0 }
  0x38   :  { %412 = vmatpush3.msra.mxu1 %v148_v13  ;;  %439 = vmatpush3.msra.mxu0 %v245_v25 }
  0x39   :  { %413 = vmatprep.subr.mxu1 %v564_v0  ;;  %440 = vmatprep.subr.mxu0 %v564_v0 }
  0x3a   :  { %414 = vmatpush3.msra.mxu1 %v147_v14  ;;  %441 = vmatpush3.msra.mxu0 %v244_v26 }
  0x3b   :  { %415 = vmatprep.subr.mxu1 %v564_v0  ;;  %442 = vmatprep.subr.mxu0 %v564_v0 }
  0x3c   :  { %416 = vmatpush3.msra.mxu1 %v146_v15  ;;  %443 = vmatpush3.msra.mxu0 %v243_v27 }
  0x3d   :  { %417 = vmatprep.subr.mxu1 %v564_v0  ;;  %444 = vmatprep.subr.mxu0 %v564_v0 }
  0x3e   :  { %418 = vmatpush3.msra.mxu1 %v145_v16  ;;  %445 = vmatpush3.msra.mxu0 %v242_v28 }
  0x3f   :  { %419 = vmatprep.subr.mxu1 %v564_v0  ;;  %446 = vmatprep.subr.mxu0 %v564_v0 }
  0x40   :  { %420 = vmatpush3.msra.mxu1 %v144_v17  ;;  %447 = vmatpush3.msra.mxu0 %v241_v29 }
  0x41   :  { %421 = vmatprep.subr.mxu1 %v564_v0  ;;  %448 = vmatprep.subr.mxu0 %v564_v0 }
  0x42   :  { %422 = vmatpush3.msra.mxu1 %v143_v18  ;;  %449 = vmatpush3.msra.mxu0 %v240_v30 }
  0x43   :  { %423 = vmatprep.subr.mxu1 %v564_v0  ;;  %450 = vmatprep.subr.mxu0 %v564_v0 }
  0x44   :  { %424 = vmatpush3.msra.mxu1 %v142_v19  ;;  %451 = vmatpush3.msra.mxu0 %v239_v31 }
  0x45   :  { %425 = vmatprep.subr.mxu1 %v564_v0  ;;  %452 = vmatprep.subr.mxu0 %v564_v0 }
  0x46   :  { %426 = vmatpush3.msra.mxu1 %v141_v20  ;;  %453 = vmatpush3.msra.mxu0 %v238_v32 }
  0x47   :  { %454 = vmatprep.subr.mxu0 %v564_v0 }
  0x48   :  { %455 = vmatpush3.msra.mxu0 %v237_v33 }
  0x49   :  { %456 = vmatprep.subr.mxu0 %v564_v0 }
  0x4a   :  { %457 = vmatpush3.msra.mxu0 %v236_v39 }
  0x4b   :  { %458 = vmatprep.subr.mxu0 %v564_v0 }
  0x4c   :  { %459 = vmatpush3.msra.mxu0 %v235_v40 }
  0x4d   :  { %460 = vmatprep.subr.mxu0 %v564_v0 }
  0x4e   :  { %461 = vmatpush3.msra.mxu0 %v234_v41 }
  0xed   :  { %v135_v35 = vpop.f32.mrf.mxu0 }
  0xee   :  { %v136_v36 = vadd.f32 %v343_v34, %v135_v35 }
  0xef   :  { %v394_v37 = vpop.f32.mrf.mxu0 }
  0xf0   :  { %v139_v38 = vmax.f32 %v136_v36, 0.0 }
  0xf2   :  { %428 = vmatmul.mubr.f32.vlgmr.msra.gmra.mxu1 %v139_v38 }
 0x1b2   :  { %v228_v43 = vpop.f32.mrf.mxu1 }
 0x1b3   :  { %v229_v44 = vadd.f32 %v346_v42, %v228_v43 }
 0x1b4   :  { %v429_v45 = vpop.f32.mrf.mxu1 }
 0x1b5   :  { %v232_v46 = vmax.f32 %v229_v44, 0.0 }
 0x1b7   :  { %463 = vmatmul.mubr.f32.vlgmr.msra.gmra.mxu0 %v232_v46 }
 0x277   :  { %v321_v48 = vpop.f32.mrf.mxu0 }
 0x278   :  { %v322_v49 = vadd.f32 %v347_v47, %v321_v48 }
 0x279   :  { %v464_v50 = vpop.f32.mrf.mxu0 }
 0x27a   :  { %326 = vst.msk [vmem:[#allocation8] sm:$0x3] %vm325_vm3, %v322_v49 }
 0x27b   :  { %544 = shalt.err (!%p541_p5)
}
 0x27c   :  { %336 = dma.vmem_to_hbm [thread:$0]  %s334_s2, 32, %s643_s3, [#allocation4]  }
 0x27d   :  { %557 = dma.done.wait [#allocation4], 32  }
 0x27e   :  { %558 = vsyncadd [#allocation4], 4294967264 }
 0x27f   :  { %340 = vsyncpa [#allocation3], 1 }
 0x280   :  { %341 = vsyncpa [#allocation6], 1 }
 0x281   :  { %342 = vsyncpa [#allocation4], 1 }

</bundles_post_ra>
